<compile_context>
chip_gen: v7x
topology: tpu7x:2x2x1
jax: 0.10.0
libtpu: 0.0.40
codegen_flags: <defaults>
</compile_context>

<pallas_src>
import jax
import jax.numpy as jnp
from jax.experimental import pallas as pl
from jax.experimental.pallas import tpu as pltpu

# Logical sizes of the PyTorch module.
INPUT_SIZE = 784
H1, H2, NUM_CLASSES = 50, 30, 10
# Lane-dense padded widths (multiples of 128).
H1_PAD, H2_PAD, OUT_PAD = 128, 128, 128


def _round_up(n, m):
    return (n + m - 1) // m * m


def _pad2(a, rows, cols):
    r, c = a.shape
    return jnp.pad(a, ((0, rows - r), (0, cols - c)))


def mlp_kernel(x_ref, w1_ref, b1_ref, w2_ref, b2_ref, w3_ref, b3_ref, o_ref):
    """Fused fc1+relu -> fc2+relu -> fc3 for one (TB, 784) batch tile.

    Inputs/weights are bf16; MXU accumulates in f32; bias-add + ReLU run in f32 on the VPU.
    Zero padding of the extra weight rows/cols keeps the math exact.
    """
    x = x_ref[...]                                                   # (TB, 784) bf16
    h1 = jnp.dot(x, w1_ref[...], preferred_element_type=jnp.float32)
    h1 = jnp.maximum(h1 + b1_ref[...], 0.0)                          # (TB, 128) f32
    h2 = jnp.dot(h1.astype(jnp.bfloat16), w2_ref[...],
                 preferred_element_type=jnp.float32)
    h2 = jnp.maximum(h2 + b2_ref[...], 0.0)                          # (TB, 128) f32
    out = jnp.dot(h2.astype(jnp.bfloat16), w3_ref[...],
                  preferred_element_type=jnp.float32) + b3_ref[...]
    o_ref[...] = out.astype(o_ref.dtype)                             # lane-dense (TB, 128) store


@jax.jit
def mlp_forward(x, w1, b1, w2, b2, w3, b3):
    """Forward pass of NN.

    x: (B, 784) f32.  w_i: (in, out) f32 (transposed vs. torch), b_i: (1, out) f32.
    Returns (B, num_classes) f32.
    """
    B = x.shape[0]
    num_classes = w3.shape[1]

    # ---- batch tiling (sized against 64 MiB v7x VMEM; v5e/v6e have more headroom) ----
    TB_MAX = 512
    if B <= TB_MAX:
        TB = _round_up(max(B, 1), 8)
        B_pad = TB
    else:
        TB = TB_MAX
        B_pad = _round_up(B, TB)
    grid = (B_pad // TB,)

    # ---- pad + cast operands (zero padding -> exact math) ----
    xb = jnp.pad(x, ((0, B_pad - B), (0, 0))).astype(jnp.bfloat16)
    w1p = _pad2(w1, INPUT_SIZE, H1_PAD).astype(jnp.bfloat16)
    w2p = _pad2(w2, H1_PAD, H2_PAD).astype(jnp.bfloat16)
    w3p = _pad2(w3, H2_PAD, OUT_PAD).astype(jnp.bfloat16)
    b1p = _pad2(b1, 1, H1_PAD)
    b2p = _pad2(b2, 1, H2_PAD)
    b3p = _pad2(b3, 1, OUT_PAD)

    # ---- explicit VMEM budget: double-buffered x/out tiles + pinned weights + slack ----
    vmem_bytes = (
        2 * TB * _round_up(INPUT_SIZE, 128) * 2                       # x tiles (bf16, 2 bufs)
        + 2 * TB * OUT_PAD * 4                                        # out tiles (f32, 2 bufs)
        + 2 * (INPUT_SIZE * H1_PAD + H1_PAD * H2_PAD + H2_PAD * OUT_PAD) * 2  # weights (bf16)
        + 2 * 3 * 8 * 128 * 4                                         # biases (sublane-padded)
        + 3 * TB * OUT_PAD * 4                                        # f32 intermediates
        + (8 << 20)                                                   # headroom
    )

    cost = pl.CostEstimate(
        flops=2 * B * (INPUT_SIZE * H1 + H1 * H2 + H2 * NUM_CLASSES),
        transcendentals=0,
        bytes_accessed=B * INPUT_SIZE * 2
        + B * num_classes * 4
        + (INPUT_SIZE * H1 + H1 * H2 + H2 * NUM_CLASSES) * 2,
    )

    out_padded = pl.pallas_call(
        mlp_kernel,
        out_shape=jax.ShapeDtypeStruct((B_pad, OUT_PAD), jnp.float32),
        grid_spec=pltpu.PrefetchScalarGridSpec(
            num_scalar_prefetch=0,
            grid=grid,
            in_specs=[
                # x streams per batch tile (double-buffered DMA).
                pl.BlockSpec((TB, INPUT_SIZE), lambda i: (i, 0)),
                # Weights / biases: constant block index -> stay VMEM-resident across tiles.
                pl.BlockSpec((INPUT_SIZE, H1_PAD), lambda i: (0, 0)),
                pl.BlockSpec((1, H1_PAD), lambda i: (0, 0)),
                pl.BlockSpec((H1_PAD, H2_PAD), lambda i: (0, 0)),
                pl.BlockSpec((1, H2_PAD), lambda i: (0, 0)),
                pl.BlockSpec((H2_PAD, OUT_PAD), lambda i: (0, 0)),
                pl.BlockSpec((1, OUT_PAD), lambda i: (0, 0)),
            ],
            out_specs=pl.BlockSpec((TB, OUT_PAD), lambda i: (i, 0)),
        ),
        compiler_params=pltpu.CompilerParams(
            dimension_semantics=("parallel",),   # batch tiles split across TCs (v7x megacore)
            vmem_limit_bytes=int(vmem_bytes),
        ),
        cost_estimate=cost,
    )(xb, w1p, b1p, w2p, b2p, w3p, b3p)

    return out_padded[:B, :num_classes]


def init_params(key, input_size=INPUT_SIZE, num_classes=NUM_CLASSES):
    """Deterministic init mimicking PyTorch nn.Linear default (uniform ±1/sqrt(fan_in)).

    Weights are stored (in_features, out_features) so the kernel computes x @ W + b.
    """
    dims = [(input_size, H1), (H1, H2), (H2, num_classes)]
    params = []
    for fan_in, fan_out in dims:
        kw, kb, key = jax.random.split(key, 3)
        bound = 1.0 / jnp.sqrt(fan_in)
        w = jax.random.uniform(kw, (fan_in, fan_out), jnp.float32, -bound, bound)
        b = jax.random.uniform(kb, (1, fan_out), jnp.float32, -bound, bound)
        params += [w, b]
    return params


def reference_forward_f32(x, w1, b1, w2, b2, w3, b3):
    h1 = jnp.maximum(x @ w1 + b1, 0.0)
    h2 = jnp.maximum(h1 @ w2 + b2, 0.0)
    return h2 @ w3 + b3


def reference_forward_bf16(x, w1, b1, w2, b2, w3, b3):
    """Mirrors the kernel's bf16 inputs / f32 accumulation."""
    hi = jax.lax.Precision.HIGHEST
    c = lambda a: a.astype(jnp.bfloat16).astype(jnp.float32)
    h1 = jnp.maximum(jnp.dot(c(x), c(w1), precision=hi) + b1, 0.0)
    h2 = jnp.maximum(jnp.dot(c(h1), c(w2), precision=hi) + b2, 0.0)
    return jnp.dot(c(h2), c(w3), precision=hi) + b3


if __name__ == "__main__":
    batch = 8

    key = jax.random.PRNGKey(0)
    kx, kp = jax.random.split(key)
    x = jax.random.normal(kx, (batch, INPUT_SIZE), dtype=jnp.float32)
    w1, b1, w2, b2, w3, b3 = init_params(kp, INPUT_SIZE, NUM_CLASSES)

    out = mlp_forward(x, w1, b1, w2, b2, w3, b3)
    out = jax.block_until_ready(out)
    assert out.shape == (batch, NUM_CLASSES)

    # Tight check against a reference that mirrors the kernel's bf16/f32 arithmetic.
    ref_bf16 = reference_forward_bf16(x, w1, b1, w2, b2, w3, b3)
    assert jnp.allclose(out, ref_bf16, atol=2e-3, rtol=2e-3)

    # Loose sanity check against pure f32 math (bf16 casts add ~0.2%/layer error).
    ref_f32 = reference_forward_f32(x, w1, b1, w2, b2, w3, b3)
    assert jnp.allclose(out, ref_f32, atol=5e-2, rtol=5e-2)

    print("KERNEL_OK")
</pallas_src>

<mosaic_0001>
module attributes {stable_mosaic.version = 11 : i64} {
  func.func @mlp_kernel(%arg0: i32, %arg1: memref<8x784xbf16, #tpu.memory_space<vmem>>, %arg2: memref<784x128xbf16, #tpu.memory_space<vmem>>, %arg3: memref<1x128xf32, #tpu.memory_space<vmem>>, %arg4: memref<128x128xbf16, #tpu.memory_space<vmem>>, %arg5: memref<1x128xf32, #tpu.memory_space<vmem>>, %arg6: memref<128x128xbf16, #tpu.memory_space<vmem>>, %arg7: memref<1x128xf32, #tpu.memory_space<vmem>>, %arg8: memref<8x128xf32, #tpu.memory_space<vmem>>) attributes {dimension_semantics = [#tpu.dimension_semantics<parallel>], iteration_bounds = array<i64: 1>, scalar_prefetch = 0 : i64, scratch_operands = 0 : i64, tpu.core_type = #tpu.core_type<tc>, window_params = [{transform_indices = @transform_0, window_bounds = array<i64: 8, 784>}, {pipeline_mode = #tpu.pipeline_mode<synchronous>, transform_indices = @transform_1, window_bounds = array<i64: 784, 128>}, {pipeline_mode = #tpu.pipeline_mode<synchronous>, transform_indices = @transform_2, window_bounds = array<i64: 1, 128>}, {pipeline_mode = #tpu.pipeline_mode<synchronous>, transform_indices = @transform_3, window_bounds = array<i64: 128, 128>}, {pipeline_mode = #tpu.pipeline_mode<synchronous>, transform_indices = @transform_4, window_bounds = array<i64: 1, 128>}, {pipeline_mode = #tpu.pipeline_mode<synchronous>, transform_indices = @transform_5, window_bounds = array<i64: 128, 128>}, {pipeline_mode = #tpu.pipeline_mode<synchronous>, transform_indices = @transform_6, window_bounds = array<i64: 1, 128>}, {transform_indices = @transform_7, window_bounds = array<i64: 8, 128>}]} {
    %c0 = arith.constant 0 : index
    %c0_0 = arith.constant 0 : index
    %0 = vector.load %arg1[%c0, %c0_0] : memref<8x784xbf16, #tpu.memory_space<vmem>>, vector<8x784xbf16>
    %c0_1 = arith.constant 0 : index
    %c0_2 = arith.constant 0 : index
    %1 = vector.load %arg2[%c0_1, %c0_2] : memref<784x128xbf16, #tpu.memory_space<vmem>>, vector<784x128xbf16>
    %cst = arith.constant dense<0.000000e+00> : vector<8x128xf32>
    %2 = tpu.matmul %0, %1, %cst {dimension_numbers = #tpu.dot_dimension_numbers<[1], [0], [0], [1], [0, 0, 1, 1], [], []>} : vector<8x784xbf16>, vector<784x128xbf16>, vector<8x128xf32> -> vector<8x128xf32>
    %c0_3 = arith.constant 0 : index
    %c0_4 = arith.constant 0 : index
    %3 = vector.load %arg3[%c0_3, %c0_4] : memref<1x128xf32, #tpu.memory_space<vmem>>, vector<1x128xf32>
    %4 = vector.broadcast %3 : vector<1x128xf32> to vector<8x128xf32>
    %5 = arith.addf %2, %4 : vector<8x128xf32>
    %cst_5 = arith.constant 0.000000e+00 : f32
    %6 = vector.broadcast %cst_5 : f32 to vector<8x128xf32>
    %7 = arith.maximumf %5, %6 : vector<8x128xf32>
    %8 = arith.truncf %7 : vector<8x128xf32> to vector<8x128xbf16>
    %c0_6 = arith.constant 0 : index
    %c0_7 = arith.constant 0 : index
    %9 = vector.load %arg4[%c0_6, %c0_7] : memref<128x128xbf16, #tpu.memory_space<vmem>>, vector<128x128xbf16>
    %cst_8 = arith.constant dense<0.000000e+00> : vector<8x128xf32>
    %10 = tpu.matmul %8, %9, %cst_8 {dimension_numbers = #tpu.dot_dimension_numbers<[1], [0], [0], [1], [0, 0, 1, 1], [], []>} : vector<8x128xbf16>, vector<128x128xbf16>, vector<8x128xf32> -> vector<8x128xf32>
    %c0_9 = arith.constant 0 : index
    %c0_10 = arith.constant 0 : index
    %11 = vector.load %arg5[%c0_9, %c0_10] : memref<1x128xf32, #tpu.memory_space<vmem>>, vector<1x128xf32>
    %12 = vector.broadcast %11 : vector<1x128xf32> to vector<8x128xf32>
    %13 = arith.addf %10, %12 : vector<8x128xf32>
    %cst_11 = arith.constant 0.000000e+00 : f32
    %14 = vector.broadcast %cst_11 : f32 to vector<8x128xf32>
    %15 = arith.maximumf %13, %14 : vector<8x128xf32>
    %16 = arith.truncf %15 : vector<8x128xf32> to vector<8x128xbf16>
    %c0_12 = arith.constant 0 : index
    %c0_13 = arith.constant 0 : index
    %17 = vector.load %arg6[%c0_12, %c0_13] : memref<128x128xbf16, #tpu.memory_space<vmem>>, vector<128x128xbf16>
    %cst_14 = arith.constant dense<0.000000e+00> : vector<8x128xf32>
    %18 = tpu.matmul %16, %17, %cst_14 {dimension_numbers = #tpu.dot_dimension_numbers<[1], [0], [0], [1], [0, 0, 1, 1], [], []>} : vector<8x128xbf16>, vector<128x128xbf16>, vector<8x128xf32> -> vector<8x128xf32>
    %c0_15 = arith.constant 0 : index
    %c0_16 = arith.constant 0 : index
    %19 = vector.load %arg7[%c0_15, %c0_16] : memref<1x128xf32, #tpu.memory_space<vmem>>, vector<1x128xf32>
    %20 = vector.broadcast %19 : vector<1x128xf32> to vector<8x128xf32>
    %21 = arith.addf %18, %20 : vector<8x128xf32>
    %c0_17 = arith.constant 0 : index
    %c0_18 = arith.constant 0 : index
    %22 = vector.load %arg8[%c0_17, %c0_18] : memref<8x128xf32, #tpu.memory_space<vmem>>, vector<8x128xf32>
    tpu.vector_store %arg8[%c0_17, %c0_18], %21 {strides = array<i32>} : memref<8x128xf32, #tpu.memory_space<vmem>>, vector<8x128xf32>,
    return
  }
  func.func @transform_0(%arg0: i32) -> (i32, i32) {
    %c0_i32 = arith.constant 0 : i32
    %c0_i32_0 = arith.constant 0 : i32
    return %arg0, %c0_i32 : i32, i32
  }
  func.func @transform_1(%arg0: i32) -> (i32, i32) {
    %c0_i32 = arith.constant 0 : i32
    %c0_i32_0 = arith.constant 0 : i32
    %c0_i32_1 = arith.constant 0 : i32
    return %c0_i32, %c0_i32_0 : i32, i32
  }
  func.func @transform_2(%arg0: i32) -> (i32, i32) {
    %c0_i32 = arith.constant 0 : i32
    %c0_i32_0 = arith.constant 0 : i32
    %c0_i32_1 = arith.constant 0 : i32
    return %c0_i32, %c0_i32_0 : i32, i32
  }
  func.func @transform_3(%arg0: i32) -> (i32, i32) {
    %c0_i32 = arith.constant 0 : i32
    %c0_i32_0 = arith.constant 0 : i32
    %c0_i32_1 = arith.constant 0 : i32
    return %c0_i32, %c0_i32_0 : i32, i32
  }
  func.func @transform_4(%arg0: i32) -> (i32, i32) {
    %c0_i32 = arith.constant 0 : i32
    %c0_i32_0 = arith.constant 0 : i32
    %c0_i32_1 = arith.constant 0 : i32
    return %c0_i32, %c0_i32_0 : i32, i32
  }
  func.func @transform_5(%arg0: i32) -> (i32, i32) {
    %c0_i32 = arith.constant 0 : i32
    %c0_i32_0 = arith.constant 0 : i32
    %c0_i32_1 = arith.constant 0 : i32
    return %c0_i32, %c0_i32_0 : i32, i32
  }
  func.func @transform_6(%arg0: i32) -> (i32, i32) {
    %c0_i32 = arith.constant 0 : i32
    %c0_i32_0 = arith.constant 0 : i32
    %c0_i32_1 = arith.constant 0 : i32
    return %c0_i32, %c0_i32_0 : i32, i32
  }
  func.func @transform_7(%arg0: i32) -> (i32, i32) {
    %c0_i32 = arith.constant 0 : i32
    %c0_i32_0 = arith.constant 0 : i32
    return %arg0, %c0_i32 : i32, i32
  }
}

</mosaic_0001>

<bundles_post_ra>
// kernel: mlp_forward.1
= control target key start
LH: loop header
LB: loop body
LE: loop exit
PB: predicated region body
PF: predicated region fallthrough
CT: control target
= control target key end

     0   :  { %v1167_v43 = vmov 0.0   ;;  %vm1168_vm0 = vmmov 0   ;;  %vm455_vm1 = vcmask 130048   ;;  %s1461_s0 = inlined_call_operand.vmem [shape: bf16[8,784], index: 0, kind: input, shape index: {}]   ;;  %s1462_s1 = inlined_call_operand.vmem [shape: bf16[784,128], index: 1, kind: input, shape index: {}]   ;;  %s1463_s2 = inlined_call_operand.vmem [shape: f32[1,128], index: 2, kind: input, shape index: {}]   ;;  %s1464_s3 = inlined_call_operand.vmem [shape: bf16[128,128], index: 3, kind: input, shape index: {}]   ;;  %s1465_s4 = inlined_call_operand.vmem [shape: f32[1,128], index: 4, kind: input, shape index: {}]   ;;  %s1466_s5 = inlined_call_operand.vmem [shape: bf16[128,128], index: 5, kind: input, shape index: {}]   ;;  %s1467_s6 = inlined_call_operand.vmem [shape: f32[1,128], index: 6, kind: input, shape index: {}]   ;;  %s1468_s7 = inlined_call_operand.hbm [shape: f32[8,128], index: 7, kind: output, shape index: {}]  }
   0x1   :  { %v1071_v0 = vld [vmem:[%s1462_s1 + $0x40] sm:$0xff]   ;;  %v1075_v4 = vld [vmem:[%s1462_s1 + $0x48] sm:$0xff]   ;;  %v1079_v8 = vld [vmem:[%s1462_s1 + $0x50] sm:$0xff]  }
   0x2   :  { %v1072_v1 = vld [vmem:[%s1462_s1] sm:$0xff]   ;;  %936 = vmatprep.subr.bf16.mxu0 %v1071_v0  ;;  %v1076_v5 = vld [vmem:[%s1462_s1 + $0x8] sm:$0xff]   ;;  %v1080_v9 = vld [vmem:[%s1462_s1 + $0x10] sm:$0xff]  }
   0x3   :  { %v1073_v2 = vld [vmem:[%s1462_s1 + $0xc0] sm:$0xff]   ;;  %937 = vmatpush3.bf16.msra.mxu0 %v1072_v1  ;;  %v1077_v6 = vld [vmem:[%s1462_s1 + $0xc8] sm:$0xff]   ;;  %v1081_v10 = vld [vmem:[%s1462_s1 + $0xd0] sm:$0xff]  }
   0x4   :  { %v1074_v3 = vld [vmem:[%s1462_s1 + $0x80] sm:$0xff]   ;;  %958 = vmatprep.subr.bf16.mxu1 %v1073_v2  ;;  %938 = vmatprep.subr.bf16.mxu0 %v1075_v4  ;;  %v1078_v7 = vld [vmem:[%s1462_s1 + $0x88] sm:$0xff]   ;;  %v1082_v11 = vld [vmem:[%s1462_s1 + $0x90] sm:$0xff]  }
   0x5   :  { %959 = vmatpush3.bf16.msra.mxu1 %v1074_v3  ;;  %v1083_v12 = vld [vmem:[%s1462_s1 + $0x58] sm:$0xff]   ;;  %v1087_v16 = vld [vmem:[%s1462_s1 + $0x60] sm:$0xff]   ;;  %v1091_v20 = vld [vmem:[%s1462_s1 + $0x68] sm:$0xff]  }
   0x6   :  { %960 = vmatprep.subr.bf16.mxu1 %v1077_v6  ;;  %v1084_v13 = vld [vmem:[%s1462_s1 + $0x18] sm:$0xff]   ;;  %v1088_v17 = vld [vmem:[%s1462_s1 + $0x20] sm:$0xff]   ;;  %v1092_v21 = vld [vmem:[%s1462_s1 + $0x28] sm:$0xff]  }
   0x7   :  { %939 = vmatpush3.bf16.msra.mxu0 %v1076_v5  ;;  %v1085_v14 = vld [vmem:[%s1462_s1 + $0xd8] sm:$0xff]   ;;  %v1089_v18 = vld [vmem:[%s1462_s1 + $0xe0] sm:$0xff]   ;;  %v1093_v22 = vld [vmem:[%s1462_s1 + $0xe8] sm:$0xff]  }
   0x8   :  { %940 = vmatprep.subr.bf16.mxu0 %v1079_v8  ;;  %v1086_v15 = vld [vmem:[%s1462_s1 + $0x98] sm:$0xff]   ;;  %v1090_v19 = vld [vmem:[%s1462_s1 + $0xa0] sm:$0xff]   ;;  %v1094_v23 = vld [vmem:[%s1462_s1 + $0xa8] sm:$0xff]  }
   0x9   :  { %961 = vmatpush3.bf16.msra.mxu1 %v1078_v7  ;;  %v1095_v24 = vld [vmem:[%s1462_s1 + $0x70] sm:$0xff]   ;;  %v1099_v28 = vld [vmem:[%s1462_s1 + $0x78] sm:$0xff]   ;;  %v28_v31 = vld [vmem:[%s1461_s0] sm:$0xff] }
   0xa   :  { %962 = vmatprep.subr.bf16.mxu1 %v1081_v10  ;;  %v1096_v25 = vld [vmem:[%s1462_s1 + $0x30] sm:$0xff]   ;;  %v1100_v29 = vld [vmem:[%s1462_s1 + $0x38] sm:$0xff]   ;;  %v861_v32 = vcombine.low %v28_v31, %v28_v31  ;;  %v862_v33 = vcombine.high %v28_v31, %v28_v31  ;;  %v1105_v35 = vld [vmem:[%s1462_s1 + $0x140] sm:$0xff]  }
   0xb   :  { %941 = vmatpush3.bf16.msra.mxu0 %v1080_v9  ;;  %v1097_v26 = vld [vmem:[%s1462_s1 + $0xf0] sm:$0xff]   ;;  %v1101_v30 = vld [vmem:[%s1462_s1 + $0xf8] sm:$0xff]   ;;  %v29_v36 = vld [vmem:[%s1461_s0 + $0x8] sm:$0xff] }
   0xc   :  { %942 = vmatprep.subr.bf16.mxu0 %v1083_v12  ;;  %v1098_v27 = vld [vmem:[%s1462_s1 + $0xb0] sm:$0xff]   ;;  %v1104_v34 = vld [vmem:[%s1462_s1 + $0xb8] sm:$0xff]   ;;  %491 = vmatprep.mubr.bf16.mxu0 %v862_v33  ;;  %v863_v37 = vcombine.low %v29_v36, %v29_v36  ;;  %v864_v38 = vcombine.high %v29_v36, %v29_v36  ;;  %v1108_v39 = vld [vmem:[%s1462_s1 + $0x100] sm:$0xff]  }
   0xd   :  { %963 = vmatpush3.bf16.msra.mxu1 %v1082_v11  ;;  %v1109_v40 = vld [vmem:[%s1462_s1 + $0x148] sm:$0xff]   ;;  %v1111_v42 = vld [vmem:[%s1462_s1 + $0x150] sm:$0xff]   ;;  %v1113_v45 = vld [vmem:[%s1462_s1 + $0x158] sm:$0xff]  }
   0xe   :  { %964 = vmatprep.subr.bf16.mxu1 %v1085_v14  ;;  %531 = vmatprep.mubr.bf16.mxu1 %v864_v38  ;;  %v1110_v41 = vld [vmem:[%s1462_s1 + $0x108] sm:$0xff]   ;;  %v1112_v44 = vld [vmem:[%s1462_s1 + $0x110] sm:$0xff]   ;;  %v1114_v46 = vld [vmem:[%s1462_s1 + $0x118] sm:$0xff]  }
   0xf   :  { %943 = vmatpush3.bf16.msra.mxu0 %v1084_v13  ;;  %v1115_v47 = vld [vmem:[%s1462_s1 + $0x160] sm:$0xff]   ;;  %v1117_v49 = vld [vmem:[%s1462_s1 + $0x168] sm:$0xff]   ;;  %v30_v51 = vld [vmem:[%s1461_s0 + $0x10] sm:$0xff] }
  0x10   :  { %944 = vmatprep.subr.bf16.mxu0 %v1087_v16  ;;  %v1116_v48 = vld [vmem:[%s1462_s1 + $0x120] sm:$0xff]   ;;  %v1118_v52 = vld [vmem:[%s1462_s1 + $0x128] sm:$0xff]   ;;  %v866_v53 = vcombine.high %v30_v51, %v30_v51  ;;  %v1126_v54 = vld [vmem:[%s1461_s0 + $0x18] ss:$0 sps:$4 sm:$0xff]  }
  0x11   :  { %965 = vmatpush3.bf16.msra.mxu1 %v1086_v15  ;;  %v1123_v50 = vld [vmem:[%s1462_s1 + $0x180] sm:$0xff]   ;;  %v1119_v55 = vld [vmem:[%s1462_s1 + $0x170] sm:$0xff]   ;;  %v1121_v57 = vld [vmem:[%s1462_s1 + $0x178] sm:$0xff]  }
  0x12   :  { %966 = vmatprep.subr.bf16.mxu1 %v1089_v18  ;;  %v1120_v56 = vld [vmem:[%s1462_s1 + $0x130] sm:$0xff]   ;;  %v1122_v58 = vld [vmem:[%s1462_s1 + $0x138] sm:$0xff]  }
  0x13   :  { %945 = vmatpush3.bf16.msra.mxu0 %v1088_v17 }
  0x14   :  { %946 = vmatprep.subr.bf16.mxu0 %v1091_v20 }
  0x15   :  { %967 = vmatpush3.bf16.msra.mxu1 %v1090_v19 }
  0x16   :  { %968 = vmatprep.subr.bf16.mxu1 %v1093_v22 }
  0x17   :  { %947 = vmatpush3.bf16.msra.mxu0 %v1092_v21 }
  0x18   :  { %948 = vmatprep.subr.bf16.mxu0 %v1095_v24 }
  0x19   :  { %969 = vmatpush3.bf16.msra.mxu1 %v1094_v23 }
  0x1a   :  { %970 = vmatprep.subr.bf16.mxu1 %v1097_v26 }
  0x1b   :  { %949 = vmatpush3.bf16.msra.mxu0 %v1096_v25 }
  0x1c   :  { %950 = vmatprep.subr.bf16.mxu0 %v1099_v28 }
  0x1d   :  { %971 = vmatpush3.bf16.msra.mxu1 %v1098_v27 }
  0x1e   :  { %972 = vmatprep.subr.bf16.mxu1 %v1101_v30 }
  0x1f   :  { %951 = vmatpush3.bf16.msra.mxu0 %v1100_v29 }
  0x20   :  { %980 = vmatprep.subr.bf16.mxu0 %v1105_v35 }
  0x21   :  { %973 = vmatpush3.bf16.msra.mxu1 %v1104_v34 }
  0x22   :  { %492 = vmatmul.mubr.bf16.vlgmr.msra.gmra.mrb[0].mxu0 %v861_v32  ;;  %1022 = vmatprep.subr.bf16.mxu1 %v1167_v43 }
  0x23   :  { %981 = vmatpush3.bf16.msra.mxu0 %v1108_v39  ;;  %571 = vmatprep.mubr.bf16.mxu0 %v866_v53 }
  0x24   :  { %532 = vmatmul.mubr.bf16.vlgmr.msra.gmra.mrb[0].mxu1 %v863_v37  ;;  %982 = vmatprep.subr.bf16.mxu0 %v1109_v40 }
  0x25   :  { %1024 = vmatprep.mubr.msk.bf16.mxu1 %vm1168_vm0, %v1167_v43  ;;  %1023 = vmatpush3.bf16.msra.mxu1 %v1123_v50 }
  0x26   :  { %1028 = vmatprep.subr.bf16.mxu1 %v1167_v43 }
  0x27   :  { %983 = vmatpush3.bf16.msra.mxu0 %v1110_v41 }
  0x28   :  { %984 = vmatprep.subr.bf16.mxu0 %v1111_v42 }
  0x2b   :  { %985 = vmatpush3.bf16.msra.mxu0 %v1112_v44 }
  0x2c   :  { %986 = vmatprep.subr.bf16.mxu0 %v1113_v45  ;;  %1025 = vmatmul.mubr.msk.bf16.vlgmr.msra.gmra.mrb[4].mxu1 %vm455_vm1, %v1126_v54 }
  0x2d   :  { %1044 = vmatprep.mubr.msk.bf16.mxu1 %vm1168_vm0, %v1167_v43 }
  0x2f   :  { %987 = vmatpush3.bf16.msra.mxu0 %v1114_v46 }
  0x30   :  { %988 = vmatprep.subr.bf16.mxu0 %v1115_v47 }
  0x33   :  { %989 = vmatpush3.bf16.msra.mxu0 %v1116_v48 }
  0x34   :  { %990 = vmatprep.subr.bf16.mxu0 %v1117_v49 }
  0x37   :  { %991 = vmatpush3.bf16.msra.mxu0 %v1118_v52 }
  0x38   :  { %992 = vmatprep.subr.bf16.mxu0 %v1119_v55 }
  0x3b   :  { %993 = vmatpush3.bf16.msra.mxu0 %v1120_v56 }
  0x3c   :  { %994 = vmatprep.subr.bf16.mxu0 %v1121_v57 }
  0x3d   :  { %12 = vsyncpa [#allocation3], 0  ;;  %v865_v59 = vcombine.low %v30_v51, %v30_v51  ;;  %v1127_v60 = vld [vmem:[%s1464_s3] sm:$0xff]   ;;  %v1128_v61 = vld [vmem:[%s1464_s3 + $0x8] sm:$0xff]   ;;  %s1169_s24 = smov [#allocation2]  }
  0x3e   :  { %1029 = vmatpush3.bf16.msra.mxu1 %v1127_v60  ;;  %v1129_v62 = vld [vmem:[%s1464_s3 + $0x10] sm:$0xff]   ;;  %v1130_v63 = vld [vmem:[%s1464_s3 + $0x18] sm:$0xff]   ;;  %v1131_v0 = vld [vmem:[%s1464_s3 + $0x20] sm:$0xff]   ;;  %s852_s25 = sshll.u32 %s1169_s24, 4  ;;  %s853_s25 = int_to_ptr.vmem [resolvable:$true] %s852_s25 }
  0x3f   :  { %995 = vmatpush3.bf16.msra.mxu0 %v1122_v58  ;;  %1030 = vmatprep.subr.bf16.mxu1 %v1167_v43  ;;  %v1132_v1 = vld [vmem:[%s1464_s3 + $0x28] sm:$0xff]   ;;  %v1133_v2 = vld [vmem:[%s1464_s3 + $0x30] sm:$0xff]   ;;  %v1134_v3 = vld [vmem:[%s1464_s3 + $0x38] sm:$0xff]   ;;  %p1148_p1 = scmp.lt.s32.totalorder %s853_s25, %s853_s25 }
  0x40   :  { %1048 = vmatprep.subr.bf16.mxu0 %v1167_v43  ;;  %v1135_v4 = vld [vmem:[%s1466_s5] sm:$0xff]   ;;  %v1136_v5 = vld [vmem:[%s1466_s5 + $0x8] sm:$0xff]   ;;  %v1137_v6 = vld [vmem:[%s1466_s5 + $0x10] sm:$0xff]  }
  0x41   :  { %v1138_v7 = vld [vmem:[%s1466_s5 + $0x18] sm:$0xff]   ;;  %v1139_v8 = vld [vmem:[%s1466_s5 + $0x20] sm:$0xff]   ;;  %v1140_v9 = vld [vmem:[%s1466_s5 + $0x28] sm:$0xff]  }
  0x42   :  { %572 = vmatmul.mubr.bf16.vlgmr.msra.gmra.mrb[4].mxu0 %v865_v59  ;;  %1031 = vmatpush3.bf16.msra.mxu1 %v1128_v61  ;;  %v860_v11 = vld [vmem:[%s1463_s2] ss:$0 sm:$0xff]  ;;  %v1141_v36 = vld [vmem:[%s1466_s5 + $0x30] sm:$0xff]   ;;  %v1142_v37 = vld [vmem:[%s1466_s5 + $0x38] sm:$0xff]  }
  0x43   :  { %1064 = vmatprep.mubr.msk.bf16.mxu0 %vm1168_vm0, %v1167_v43  ;;  %1032 = vmatprep.subr.bf16.mxu1 %v1167_v43  ;;  %v918_v38 = vld [vmem:[%s1465_s4] ss:$0 sm:$0xff]  ;;  %s1143_s4 = scalar_lea.vmem %s853_s25, 128 }
  0x44   :  { %1049 = vmatpush3.bf16.msra.mxu0 %v1135_v4  ;;  %p1144_p0 = scmp.ne.s32.totalorder %s853_s25, %s1143_s4  ;;  %p1149_p2 = scmp.lt.s32.totalorder %s1143_s4, %s1143_s4 }
  0x45   :  { %1050 = vmatprep.subr.bf16.mxu0 %v1167_v43 }
  0x46   :  { %1033 = vmatpush3.bf16.msra.mxu1 %v1129_v62  ;;  %p1150_p3 = por %p1149_p2, %p1148_p1 }
  0x47   :  { %1034 = vmatprep.subr.bf16.mxu1 %v1167_v43 }
  0x48   :  { %1051 = vmatpush3.bf16.msra.mxu0 %v1136_v5  ;;  %p1151_p4 = pnand %p1150_p3, %p1144_p0 }
  0x49   :  { %1052 = vmatprep.subr.bf16.mxu0 %v1167_v43 }
  0x4a   :  { %1035 = vmatpush3.bf16.msra.mxu1 %v1130_v63 }
  0x4b   :  { %1036 = vmatprep.subr.bf16.mxu1 %v1167_v43 }
  0x4c   :  { %1053 = vmatpush3.bf16.msra.mxu0 %v1137_v6 }
  0x4d   :  { %1054 = vmatprep.subr.bf16.mxu0 %v1167_v43 }
  0x4e   :  { %1037 = vmatpush3.bf16.msra.mxu1 %v1131_v0 }
  0x4f   :  { %1038 = vmatprep.subr.bf16.mxu1 %v1167_v43 }
  0x50   :  { %1055 = vmatpush3.bf16.msra.mxu0 %v1138_v7 }
  0x51   :  { %1056 = vmatprep.subr.bf16.mxu0 %v1167_v43 }
  0x52   :  { %1039 = vmatpush3.bf16.msra.mxu1 %v1132_v1 }
  0x53   :  { %1040 = vmatprep.subr.bf16.mxu1 %v1167_v43 }
  0x54   :  { %1057 = vmatpush3.bf16.msra.mxu0 %v1139_v8 }
  0x55   :  { %1058 = vmatprep.subr.bf16.mxu0 %v1167_v43 }
  0x56   :  { %1041 = vmatpush3.bf16.msra.mxu1 %v1133_v2 }
  0x57   :  { %1042 = vmatprep.subr.bf16.mxu1 %v1167_v43 }
  0x58   :  { %1059 = vmatpush3.bf16.msra.mxu0 %v1140_v9 }
  0x59   :  { %1060 = vmatprep.subr.bf16.mxu0 %v1167_v43 }
  0x5a   :  { %1043 = vmatpush3.bf16.msra.mxu1 %v1134_v3 }
  0x5c   :  { %1061 = vmatpush3.bf16.msra.mxu0 %v1141_v36 }
  0x5d   :  { %1062 = vmatprep.subr.bf16.mxu0 %v1167_v43  ;;  %v927_v43 = vld [vmem:[%s1467_s6] ss:$0 sm:$0xff] }
  0x60   :  { %1063 = vmatpush3.bf16.msra.mxu0 %v1142_v37 }
  0xf5   :  { %v952_v10 = vpop.f32.mrb[0].mxu0 }
  0xf6   :  { %v953_v12 = vpop.f32.mrb[1].mxu0 }
  0xf7   :  { %v954_v13 = vadd.f32 %v953_v12, %v952_v10  ;;  %v955_v14 = vpop.f32.mrb[2].mxu0  ;;  %v974_v15 = vpop.f32.mrb[0].mxu1 }
  0xf8   :  { %v956_v16 = vpop.f32.mrb[3].mxu0  ;;  %v975_v17 = vpop.f32.mrb[1].mxu1 }
  0xf9   :  { %v494_v18 = vadd.f32 %v954_v13, %v860_v11  ;;  %v976_v19 = vadd.f32 %v975_v17, %v974_v15  ;;  %v977_v20 = vpop.f32.mrb[2].mxu1 }
  0xfa   :  { %v978_v21 = vpop.f32.mrb[3].mxu1 }
  0xfb   :  { %v534_v22 = vadd.f32 %v976_v19, %v494_v18 }
  0xff   :  { %v613_v23 = vpop.f32.mrb[4].mxu1 }
 0x100   :  { %v1026_v24 = vpop.f32.mrb[5].mxu1 }
 0x101   :  { %v616_v25 = vpop.f32.mrb[6].mxu1 }
 0x102   :  { %v1027_v26 = vpop.f32.mrb[7].mxu1 }
 0x115   :  { %v996_v27 = vpop.f32.mrb[4].mxu0 }
 0x116   :  { %v997_v28 = vpop.f32.mrb[5].mxu0 }
 0x117   :  { %v998_v29 = vadd.f32 %v997_v28, %v996_v27  ;;  %v999_v30 = vpop.f32.mrb[6].mxu0 }
 0x118   :  { %v1000_v31 = vpop.f32.mrb[7].mxu0 }
 0x119   :  { %v574_v32 = vadd.f32 %v998_v29, %v534_v22 }
 0x11b   :  { %v614_v33 = vadd.f32 %v613_v23, %v574_v32 }
 0x11d   :  { %v619_v34 = vmax.f32 %v614_v33, 0.0 }
 0x11f   :  { %v620_v35 = vpack.c.bf16 %v619_v34, %v619_v34 }
 0x121   :  { %1045 = vmatmul.mubr.bf16.vlgmr.msra.gmra.mrb[8].mxu1 %v620_v35 }
 0x1f4   :  { %v726_v39 = vpop.f32.mrb[8].mxu1 }
 0x1f5   :  { %v727_v40 = vadd.f32 %v918_v38, %v726_v39  ;;  %v1046_v41 = vpop.f32.mrb[9].mxu1 }
 0x1f6   :  { %v729_v42 = vpop.f32.mrb[10].mxu1 }
 0x1f7   :  { %v732_v44 = vmax.f32 %v727_v40, 0.0  ;;  %v1047_v45 = vpop.f32.mrb[11].mxu1 }
 0x1f9   :  { %v733_v46 = vpack.c.bf16 %v732_v44, %v732_v44 }
 0x1fb   :  { %1065 = vmatmul.mubr.bf16.vlgmr.msra.gmra.mrb[8].mxu0 %v733_v46 }
 0x2ce   :  { %v839_v47 = vpop.f32.mrb[8].mxu0 }
 0x2cf   :  { %v840_v48 = vadd.f32 %v927_v43, %v839_v47  ;;  %v1066_v49 = vpop.f32.mrb[9].mxu0 }
 0x2d0   :  { %v842_v50 = vpop.f32.mrb[10].mxu0 }
 0x2d1   :  { %845 = vst [vmem:[#allocation2] sm:$0xff] %v840_v48  ;;  %v1067_v51 = vpop.f32.mrb[11].mxu0 }
 0x2d2   :  { %1154 = shalt.err (!%p1151_p4)
}
 0x2d3   :  { %s1155_s6 = scalar_lea.hbm %s1468_s7, 128 }
 0x2d4   :  { %p1156_p5 = scmp.ne.s32.totalorder %s1468_s7, %s1155_s6  ;;  %p1159_p6 = scmp.lt.u32.totalorder %s1155_s6, %s1468_s7 }
 0x2d6   :  { %p1161_p7 = pnand %p1159_p6, %p1156_p5 }
 0x2d8   :  { %1164 = shalt.err (!%p1161_p7)
}
 0x2d9   :  { %855 = dma.vmem_to_hbm [thread:$0]  %s853_s25, 128, %s1468_s7, [#allocation3]  }
 0x2da   :  { %1165 = dma.done.wait [#allocation3], 128  }
 0x2db   :  { %1166 = vsyncadd [#allocation3], 4294967168 }
 0x2dc   :  { %859 = vsyncpa [#allocation3], 1 }

</bundles_post_ra>
